<compile_context>
chip_gen: v5e
topology: v5e:2x2
jax: 0.10.0
libtpu: 0.0.40
codegen_flags: <defaults>
</compile_context>

<pallas_src>
import jax
import jax.numpy as jnp
from jax.experimental import pallas as pl
from jax.experimental.pallas import tpu as pltpu

BN_EPS = 1e-5
TB_MAX = 1024   # max batch tile (sweepable 1024-2048; 1024 keeps VMEM tiny everywhere)


def _round_up(x, m):
    return ((x + m - 1) // m) * m


def _choose_tb(batch):
    """Batch tile: large enough to amortize per-step overhead; >=2 balanced tiles
    for v7x's 2 TensorCores once the batch is big enough."""
    if batch <= 256:
        return _round_up(batch, 8)                      # single small tile
    return min(TB_MAX, _round_up(pl.cdiv(batch, 2), 256))


# ---------------------------------------------------------------------------
# Kernel
# ---------------------------------------------------------------------------
def mlp_kernel(x_ref, w1_ref, b1_ref, w2_ref, b2_ref, w3t_ref, b3t_ref, out_ref):
    # Layer 1: Linear (BN folded) -> ReLU -> Dropout (eval = identity)
    x = x_ref[...].astype(w1_ref.dtype)                 # f32 from HBM, cast on VPU
    h = jnp.dot(x, w1_ref[...], preferred_element_type=jnp.float32) + b1_ref[...]
    h = jnp.maximum(h, 0.0)
    # TODO(synk): Dropout(p=0.3) is identity in eval mode; training-mode PRNG mask
    # (pltpu.prng_seed / prng_random_bits) not implemented.

    # Layer 2: Linear (BN folded) -> ReLU -> Dropout (eval = identity)
    h = jnp.dot(h.astype(w2_ref.dtype), w2_ref[...],
                preferred_element_type=jnp.float32) + b2_ref[...]
    h = jnp.maximum(h, 0.0)

    # Output layer, computed transposed: out_t[o, b] = sum_k w3t[o, k] * h[b, k]
    # (A @ B^T on the MXU). Stored slab is (out_pad, TB): batch on the lane axis,
    # full-lane stores, and only out_pad values written back per batch row.
    out_t = jax.lax.dot_general(
        w3t_ref[...], h.astype(w3t_ref.dtype),
        dimension_numbers=(((1,), (1,)), ((), ())),
        preferred_element_type=jnp.float32)
    out_ref[...] = (out_t + b3t_ref[...]).astype(out_ref.dtype)


# ---------------------------------------------------------------------------
# Parameter preparation (host-side, one time)
# ---------------------------------------------------------------------------
def _fold_bn(w, b, gamma, beta, mean, var):
    """Fold BatchNorm1d (running stats) into the preceding Linear."""
    scale = gamma * jax.lax.rsqrt(var + BN_EPS)          # [1, F]
    w_f = w * scale                                      # per-output-column scale
    b_f = (b - mean) * scale + beta
    return w_f, b_f


def prepare_inference_params(params, compute_dtype=jnp.bfloat16):
    """Fold BN, transpose+pad the final layer to a sublane multiple, cast to MXU dtype."""
    w1, b1 = _fold_bn(params["w1"], params["b1"], params["g1"],
                      params["be1"], params["m1"], params["v1"])
    w2, b2 = _fold_bn(params["w2"], params["b2"], params["g2"],
                      params["be2"], params["m2"], params["v2"])
    w3, b3 = params["w3"], params["b3"]                  # [hidden, out], [1, out]

    out_dim = w3.shape[1]
    o_pad = _round_up(out_dim, 8)                        # no <=128 assumption
    w3t = jnp.pad(w3.T, ((0, o_pad - out_dim), (0, 0)))  # [o_pad, hidden]
    b3t = jnp.pad(b3.T, ((0, o_pad - out_dim), (0, 0)))  # [o_pad, 1]

    return dict(
        w1=w1.astype(compute_dtype), b1=b1.astype(jnp.float32),
        w2=w2.astype(compute_dtype), b2=b2.astype(jnp.float32),
        w3t=w3t.astype(compute_dtype), b3t=b3t.astype(jnp.float32),
        output_dim=out_dim,
    )


# ---------------------------------------------------------------------------
# Wrapper
# ---------------------------------------------------------------------------
def _vmem_limit_bytes(tb, input_dim, hidden, o_pad, weights):
    w_bytes = sum(int(a.size) * a.dtype.itemsize for a in weights)
    x_tile = 2 * tb * input_dim * 4          # double-buffered f32 input tile
    o_tile = 2 * o_pad * tb * 4              # double-buffered f32 output tile
    inter = 4 * tb * hidden * 4              # f32 intermediates headroom
    budget = 2 * (w_bytes + x_tile + o_tile + inter)     # 2x headroom
    return int(min(max(budget, 16 * 2**20), 48 * 2**20))


def mlp_classifier_forward(x, prep):
    """x: [B, input_dim] float32. prep: output of prepare_inference_params."""
    B, input_dim = x.shape
    output_dim = prep["output_dim"]
    o_pad, hidden = prep["w3t"].shape

    tb = _choose_tb(B)
    n_tiles = pl.cdiv(B, tb)
    Bp = n_tiles * tb
    if Bp != B:
        x = jnp.pad(x, ((0, Bp - B), (0, 0)))            # branch-free kernel, no masks

    weights = (prep["w1"], prep["b1"], prep["w2"], prep["b2"],
               prep["w3t"], prep["b3t"])

    def resident(a):
        # Full-array block with a constant block index: VMEM-resident, never re-DMA'd.
        nd = a.ndim
        return pl.BlockSpec(a.shape, lambda i, _nd=nd: (0,) * _nd)

    out_t = pl.pallas_call(
        mlp_kernel,
        out_shape=jax.ShapeDtypeStruct((o_pad, Bp), jnp.float32),
        grid=(n_tiles,),
        in_specs=[pl.BlockSpec((tb, input_dim), lambda i: (i, 0))]
                 + [resident(a) for a in weights],
        out_specs=pl.BlockSpec((o_pad, tb), lambda i: (0, i)),
        compiler_params=pltpu.CompilerParams(
            dimension_semantics=("parallel",),
            vmem_limit_bytes=_vmem_limit_bytes(tb, input_dim, hidden, o_pad, weights)),
    )(x, *weights)

    # Tiny XLA-side slice + transpose back to [B, output_dim].
    return out_t[:output_dim, :B].T


# ---------------------------------------------------------------------------
# Synthetic params + pure-JAX reference
# ---------------------------------------------------------------------------
def init_params(key, input_dim, hidden_dim=128, output_dim=2):
    """Deterministic synthetic parameters matching MLPClassifier(num_layers=3)."""
    ks = jax.random.split(key, 6)

    def linear(kw, kb, fan_in, fan_out):
        # PyTorch-style uniform(-1/sqrt(fan_in), 1/sqrt(fan_in)); stored as [in, out]
        bound = 1.0 / jnp.sqrt(jnp.float32(fan_in))
        w = jax.random.uniform(kw, (fan_in, fan_out), jnp.float32, -bound, bound)
        b = jax.random.uniform(kb, (1, fan_out), jnp.float32, -bound, bound)
        return w, b

    w1, b1 = linear(ks[0], ks[1], input_dim, hidden_dim)
    w2, b2 = linear(ks[2], ks[3], hidden_dim, hidden_dim)
    w3, b3 = linear(ks[4], ks[5], hidden_dim, output_dim)

    # BatchNorm1d defaults: gamma=1, beta=0, running_mean=0, running_var=1
    ones_h = jnp.ones((1, hidden_dim), jnp.float32)
    zeros_h = jnp.zeros((1, hidden_dim), jnp.float32)

    return dict(
        w1=w1, b1=b1, g1=ones_h, be1=zeros_h, m1=zeros_h, v1=ones_h,
        w2=w2, b2=b2, g2=ones_h, be2=zeros_h, m2=zeros_h, v2=ones_h,
        w3=w3, b3=b3,
    )


def reference_forward(x, p):
    """Pure-JAX f32 reference (unfolded BN) for a sanity check."""
    h = x @ p["w1"] + p["b1"]
    h = (h - p["m1"]) / jnp.sqrt(p["v1"] + BN_EPS) * p["g1"] + p["be1"]
    h = jnp.maximum(h, 0.0)
    h = h @ p["w2"] + p["b2"]
    h = (h - p["m2"]) / jnp.sqrt(p["v2"] + BN_EPS) * p["g2"] + p["be2"]
    h = jnp.maximum(h, 0.0)
    return h @ p["w3"] + p["b3"]


if __name__ == "__main__":
    key = jax.random.PRNGKey(0)
    k_x, k_p = jax.random.split(key)

    batch = 8
    input_dim = 32
    hidden_dim = 128
    output_dim = 2

    x = jax.random.normal(k_x, (batch, input_dim), jnp.float32)
    params = init_params(k_p, input_dim, hidden_dim, output_dim)
    prep = prepare_inference_params(params)

    out = mlp_classifier_forward(x, prep)
    out = jax.block_until_ready(out)

    ref = reference_forward(x, params)
    assert out.shape == (batch, output_dim)
    # bf16 MXU inputs (f32 accumulation) => bf16-level tolerance vs the f32 reference.
    assert jnp.allclose(out, ref, atol=5e-2, rtol=5e-2), "mismatch vs reference"

    print("KERNEL_OK")
</pallas_src>

<mosaic_0001>
module attributes {stable_mosaic.version = 11 : i64} {
  func.func @mlp_kernel(%arg0: i32, %arg1: memref<8x32xf32, #tpu.memory_space<vmem>>, %arg2: memref<32x128xbf16, #tpu.memory_space<vmem>>, %arg3: memref<1x128xf32, #tpu.memory_space<vmem>>, %arg4: memref<128x128xbf16, #tpu.memory_space<vmem>>, %arg5: memref<1x128xf32, #tpu.memory_space<vmem>>, %arg6: memref<8x128xbf16, #tpu.memory_space<vmem>>, %arg7: memref<8x1xf32, #tpu.memory_space<vmem>>, %arg8: memref<8x8xf32, #tpu.memory_space<vmem>>) attributes {dimension_semantics = [#tpu.dimension_semantics<parallel>], iteration_bounds = array<i64: 1>, scalar_prefetch = 0 : i64, scratch_operands = 0 : i64, tpu.core_type = #tpu.core_type<tc>, window_params = [{transform_indices = @transform_0, window_bounds = array<i64: 8, 32>}, {pipeline_mode = #tpu.pipeline_mode<synchronous>, transform_indices = @transform_1, window_bounds = array<i64: 32, 128>}, {pipeline_mode = #tpu.pipeline_mode<synchronous>, transform_indices = @transform_2, window_bounds = array<i64: 1, 128>}, {pipeline_mode = #tpu.pipeline_mode<synchronous>, transform_indices = @transform_3, window_bounds = array<i64: 128, 128>}, {pipeline_mode = #tpu.pipeline_mode<synchronous>, transform_indices = @transform_4, window_bounds = array<i64: 1, 128>}, {pipeline_mode = #tpu.pipeline_mode<synchronous>, transform_indices = @transform_5, window_bounds = array<i64: 8, 128>}, {pipeline_mode = #tpu.pipeline_mode<synchronous>, transform_indices = @transform_6, window_bounds = array<i64: 8, 1>}, {transform_indices = @transform_7, window_bounds = array<i64: 8, 8>}]} {
    %c0 = arith.constant 0 : index
    %c0_0 = arith.constant 0 : index
    %0 = vector.load %arg1[%c0, %c0_0] : memref<8x32xf32, #tpu.memory_space<vmem>>, vector<8x32xf32>
    %1 = arith.truncf %0 : vector<8x32xf32> to vector<8x32xbf16>
    %c0_1 = arith.constant 0 : index
    %c0_2 = arith.constant 0 : index
    %2 = vector.load %arg2[%c0_1, %c0_2] : memref<32x128xbf16, #tpu.memory_space<vmem>>, vector<32x128xbf16>
    %cst = arith.constant dense<0.000000e+00> : vector<8x128xf32>
    %3 = tpu.matmul %1, %2, %cst {dimension_numbers = #tpu.dot_dimension_numbers<[1], [0], [0], [1], [0, 0, 1, 1], [], []>} : vector<8x32xbf16>, vector<32x128xbf16>, vector<8x128xf32> -> vector<8x128xf32>
    %c0_3 = arith.constant 0 : index
    %c0_4 = arith.constant 0 : index
    %4 = vector.load %arg3[%c0_3, %c0_4] : memref<1x128xf32, #tpu.memory_space<vmem>>, vector<1x128xf32>
    %5 = vector.broadcast %4 : vector<1x128xf32> to vector<8x128xf32>
    %6 = arith.addf %3, %5 : vector<8x128xf32>
    %cst_5 = arith.constant 0.000000e+00 : f32
    %7 = vector.broadcast %cst_5 : f32 to vector<8x128xf32>
    %8 = arith.maximumf %6, %7 : vector<8x128xf32>
    %9 = arith.truncf %8 : vector<8x128xf32> to vector<8x128xbf16>
    %c0_6 = arith.constant 0 : index
    %c0_7 = arith.constant 0 : index
    %10 = vector.load %arg4[%c0_6, %c0_7] : memref<128x128xbf16, #tpu.memory_space<vmem>>, vector<128x128xbf16>
    %cst_8 = arith.constant dense<0.000000e+00> : vector<8x128xf32>
    %11 = tpu.matmul %9, %10, %cst_8 {dimension_numbers = #tpu.dot_dimension_numbers<[1], [0], [0], [1], [0, 0, 1, 1], [], []>} : vector<8x128xbf16>, vector<128x128xbf16>, vector<8x128xf32> -> vector<8x128xf32>
    %c0_9 = arith.constant 0 : index
    %c0_10 = arith.constant 0 : index
    %12 = vector.load %arg5[%c0_9, %c0_10] : memref<1x128xf32, #tpu.memory_space<vmem>>, vector<1x128xf32>
    %13 = vector.broadcast %12 : vector<1x128xf32> to vector<8x128xf32>
    %14 = arith.addf %11, %13 : vector<8x128xf32>
    %cst_11 = arith.constant 0.000000e+00 : f32
    %15 = vector.broadcast %cst_11 : f32 to vector<8x128xf32>
    %16 = arith.maximumf %14, %15 : vector<8x128xf32>
    %c0_12 = arith.constant 0 : index
    %c0_13 = arith.constant 0 : index
    %17 = vector.load %arg6[%c0_12, %c0_13] : memref<8x128xbf16, #tpu.memory_space<vmem>>, vector<8x128xbf16>
    %18 = arith.truncf %16 : vector<8x128xf32> to vector<8x128xbf16>
    %cst_14 = arith.constant dense<0.000000e+00> : vector<8x8xf32>
    %19 = tpu.matmul %17, %18, %cst_14 {dimension_numbers = #tpu.dot_dimension_numbers<[1], [1], [0], [0], [0, 0, 1, 0], [], []>} : vector<8x128xbf16>, vector<8x128xbf16>, vector<8x8xf32> -> vector<8x8xf32>
    %c0_15 = arith.constant 0 : index
    %c0_16 = arith.constant 0 : index
    %20 = vector.load %arg7[%c0_15, %c0_16] : memref<8x1xf32, #tpu.memory_space<vmem>>, vector<8x1xf32>
    %21 = vector.broadcast %20 : vector<8x1xf32> to vector<8x8xf32>
    %22 = arith.addf %19, %21 : vector<8x8xf32>
    %c0_17 = arith.constant 0 : index
    %c0_18 = arith.constant 0 : index
    %23 = vector.load %arg8[%c0_17, %c0_18] : memref<8x8xf32, #tpu.memory_space<vmem>>, vector<8x8xf32>
    tpu.vector_store %arg8[%c0_17, %c0_18], %22 {strides = array<i32>} : memref<8x8xf32, #tpu.memory_space<vmem>>, vector<8x8xf32>,
    return
  }
  func.func @transform_0(%arg0: i32) -> (i32, i32) {
    %c0_i32 = arith.constant 0 : i32
    %c0_i32_0 = arith.constant 0 : i32
    return %arg0, %c0_i32 : i32, i32
  }
  func.func @transform_1(%arg0: i32) -> (i32, i32) {
    %c0_i32 = arith.constant 0 : i32
    %c0_i32_0 = arith.constant 0 : i32
    %c0_i32_1 = arith.constant 0 : i32
    return %c0_i32, %c0_i32_0 : i32, i32
  }
  func.func @transform_2(%arg0: i32) -> (i32, i32) {
    %c0_i32 = arith.constant 0 : i32
    %c0_i32_0 = arith.constant 0 : i32
    %c0_i32_1 = arith.constant 0 : i32
    return %c0_i32, %c0_i32_0 : i32, i32
  }
  func.func @transform_3(%arg0: i32) -> (i32, i32) {
    %c0_i32 = arith.constant 0 : i32
    %c0_i32_0 = arith.constant 0 : i32
    %c0_i32_1 = arith.constant 0 : i32
    return %c0_i32, %c0_i32_0 : i32, i32
  }
  func.func @transform_4(%arg0: i32) -> (i32, i32) {
    %c0_i32 = arith.constant 0 : i32
    %c0_i32_0 = arith.constant 0 : i32
    %c0_i32_1 = arith.constant 0 : i32
    return %c0_i32, %c0_i32_0 : i32, i32
  }
  func.func @transform_5(%arg0: i32) -> (i32, i32) {
    %c0_i32 = arith.constant 0 : i32
    %c0_i32_0 = arith.constant 0 : i32
    %c0_i32_1 = arith.constant 0 : i32
    return %c0_i32, %c0_i32_0 : i32, i32
  }
  func.func @transform_6(%arg0: i32) -> (i32, i32) {
    %c0_i32 = arith.constant 0 : i32
    %c0_i32_0 = arith.constant 0 : i32
    %c0_i32_1 = arith.constant 0 : i32
    return %c0_i32, %c0_i32_0 : i32, i32
  }
  func.func @transform_7(%arg0: i32) -> (i32, i32) {
    %c0_i32 = arith.constant 0 : i32
    %c0_i32_0 = arith.constant 0 : i32
    return %c0_i32, %arg0 : i32, i32
  }
}

</mosaic_0001>

<bundles_post_ra>
// kernel: tpu_custom_call.1
= control target key start
LH: loop header
LB: loop body
LE: loop exit
PB: predicated region body
PF: predicated region fallthrough
CT: control target
= control target key end

     0   :  { %12 = vsyncpa [#allocation3], 0  ;;  %s471_s0 = inlined_call_operand.vmem [shape: f32[8,32], index: 0, kind: input, shape index: {}]   ;;  %s472_s1 = inlined_call_operand.hbm [shape: bf16[32,128], index: 1, kind: input, shape index: {}]   ;;  %s473_s2 = inlined_call_operand.vmem [shape: f32[1,128], index: 2, kind: input, shape index: {}]   ;;  %s474_s3 = inlined_call_operand.hbm [shape: bf16[128,128], index: 3, kind: input, shape index: {}]   ;;  %s475_s4 = inlined_call_operand.vmem [shape: f32[1,128], index: 4, kind: input, shape index: {}]   ;;  %s476_s5 = inlined_call_operand.hbm [shape: bf16[8,128], index: 5, kind: input, shape index: {}]   ;;  %s477_s6 = inlined_call_operand.vmem [shape: f32[8,1], index: 6, kind: input, shape index: {}]   ;;  %s478_s7 = inlined_call_operand.hbm [shape: f32[8,8], index: 7, kind: output, shape index: {}]  }
   0x1   :  { %13 = vsyncpa [#allocation6], 0 }
   0x2   :  { %14 = vsyncpa [#allocation4], 0  ;;  %s36_s26 = sshll.u32 %s474_s3, 4  ;;  %s400_s27 = smov [#allocation5]   ;;  %s37_s26 = int_to_ptr.hbm [resolvable:$true] %s36_s26 }
   0x3   :  { %s38_s28 = sshll.u32 %s400_s27, 4  ;;  %s21_s8 = sshll.u32 %s472_s1, 4  ;;  %s39_s28 = int_to_ptr.vmem [resolvable:$true] %s38_s28  ;;  %s22_s8 = int_to_ptr.hbm [resolvable:$true] %s21_s8 }
   0x4   :  { %s401_s9 = smov 64   ;;  %s402_s10 = smov 4  }
   0x5   :  { %44 = dma.hbm_to_vmem [thread:$0]  %s37_s26, 1024, %s39_s28, [#allocation6], %s401_s9, %s401_s9, %s402_s10  }
   0x6   :  { %s403_s11 = smov [#allocation2]   ;;  %s52_s15 = sshll.u32 %s476_s5, 4  ;;  %s53_s15 = int_to_ptr.hbm [resolvable:$true] %s52_s15 }
   0x7   :  { %s23_s12 = sshll.u32 %s403_s11, 4  ;;  %s404_s3 = smov [#allocation7]   ;;  %s24_s12 = int_to_ptr.vmem [resolvable:$true] %s23_s12 }
   0x8   :  { %29 = dma.hbm_to_vmem [thread:$0]  %s22_s8, 256, %s24_s12, [#allocation3], %s401_s9, %s401_s9, %s402_s10  }
   0x9   :  { %s54_s16 = sshll.u32 %s404_s3, 4  ;;  %s55_s16 = int_to_ptr.vmem [resolvable:$true] %s54_s16 }
   0xa   :  { %57 = dma.hbm_to_vmem [thread:$0]  %s53_s15, 64, %s55_s16, [#allocation6]  }
   0xb   :  { %394 = dma.done.wait [#allocation3], 256  }
   0xc   :  { %395 = vsyncadd [#allocation3], 4294967040 }
   0xd   :  { %396 = dma.done.wait [#allocation6], 1088  }
   0xe   :  { %397 = vsyncadd [#allocation6], 4294966208  ;;  %v279_v0 = vld [vmem:[#allocation2 + $0x8] sm:$0xff]  ;;  %v278_v2 = vld [vmem:[#allocation2] sm:$0xff]  ;;  %vm95_vm0 = vcmask 261120   ;;  %v405_v19 = vmov 0  }
   0xf   :  { %v287_v1 = vld [vmem:[#allocation5 + $0x38] sm:$0xff]  ;;  %105 = vmatpush.bf16.msra.mxu0 %v279_v0  ;;  %v73_v3 = vld [vmem:[%s471_s0] sm:$0xff]  ;;  %v285_v6 = vld [vmem:[#allocation5 + $0x28] sm:$0xff]  ;;  %295 = vset.pattern.permute.xlu0 %v405_v19  ;;  %s226_s24 = sshll.u32 %s478_s7, 4  ;;  %vm217_vm1 = vcmask 64512   ;;  %s227_s24 = int_to_ptr.hbm [resolvable:$true] %s226_s24 }
  0x10   :  { %182 = vmatpush.bf16.msra.mxu1 %v287_v1  ;;  %v286_v4 = vld [vmem:[#allocation5 + $0x30] sm:$0xff]  ;;  %v74_v5 = vpack.c.bf16 %v73_v3, %v73_v3  ;;  %v284_v7 = vld [vmem:[#allocation5 + $0x20] sm:$0xff]  ;;  %v283_v8 = vld [vmem:[#allocation5 + $0x18] sm:$0xff] }
  0x11   :  { %v282_v9 = vld [vmem:[#allocation5 + $0x10] sm:$0xff]  ;;  %v281_v10 = vld [vmem:[#allocation5 + $0x8] sm:$0xff]  ;;  %v280_v11 = vld [vmem:[#allocation5] sm:$0xff] }
  0x12   :  { %v296_v12 = vld [vmem:[%s473_s2] ss:$0 sm:$0xff]  ;;  %v196_v26 = vld [vmem:[#allocation7] sm:$0xf]  ;;  %s406_s2 = smov [#allocation8]  }
  0x13   :  { %106 = vmatpush.bf16.msra.mxu0 %v278_v2  ;;  %v198_v18 = vld [vmem:[%s477_s6] sm:$0xff]  ;;  %s224_s22 = sshll.u32 %s406_s2, 4  ;;  %s225_s22 = int_to_ptr.vmem [resolvable:$true] %s224_s22 }
  0x14   :  { %183 = vmatpush.bf16.msra.mxu1 %v286_v4  ;;  %201 = vperm.xlu0 %295, %v198_v18   ;;  %v297_v20 = vld [vmem:[%s475_s4] ss:$0 sm:$0xff] }
  0x16   :  { %245 = vmatmul.msk.bf16.vlgmr.msra.gmra.mxu0 %vm95_vm0, %v74_v5 }
  0x18   :  { %184 = vmatpush.bf16.msra.mxu1 %v285_v6 }
  0x1c   :  { %185 = vmatpush.bf16.msra.mxu1 %v284_v7 }
  0x20   :  { %186 = vmatpush.bf16.msra.mxu1 %v283_v8 }
  0x24   :  { %187 = vmatpush.bf16.msra.mxu1 %v282_v9 }
  0x28   :  { %188 = vmatpush.bf16.msra.mxu1 %v281_v10 }
  0x2c   :  { %189 = vmatpush.bf16.msra.mxu1 %v280_v11 }
  0x86   :  { %v202_v27 = vpop.permute.xlu0 %201 }
  0x93   :  { %v108_v13 = vpop.f32.mrf.mxu0 }
  0x94   :  { %v109_v14 = vadd.f32 %v296_v12, %v108_v13 }
  0x96   :  { %v112_v15 = vmax.f32 %v109_v14, 0.0 }
  0x98   :  { %v113_v16 = vpack.c.bf16 %v112_v15, %v112_v15 }
  0x9a   :  { %190 = vmatmul.bf16.vlgmr.msra.gmra.mxu1 %v113_v16 }
  0x9b   :  { %v110_v17 = vpop.f32.mrf.mxu0 }
 0x117   :  { %v191_v21 = vpop.f32.mrf.mxu1 }
 0x118   :  { %v192_v22 = vadd.f32 %v297_v20, %v191_v21 }
 0x11a   :  { %v195_v23 = vmax.f32 %v192_v22, 0.0 }
 0x11c   :  { %v197_v24 = vpack.c.bf16 %v195_v23, %v195_v23 }
 0x11e   :  { %211 = vmatpush.bf16.xpose.msra.mxu2 %v197_v24 }
 0x11f   :  { %v193_v25 = vpop.f32.mrf.mxu1 }
 0x125   :  { %212 = vmatmul.bf16.vlgmr.msra.gmra.mxu2 %v196_v26 }
 0x1a8   :  { %v213_v28 = vpop.f32.mrf.mxu2 }
 0x1a9   :  { %v214_v29 = vadd.f32 %v213_v28, %v202_v27 }
 0x1ab   :  { %218 = vst.msk [vmem:[#allocation8] sm:$0xff] %vm217_vm1, %v214_v29 }
 0x1ac   :  { %229 = dma.vmem_to_hbm [thread:$0]  %s225_s22, 128, %s227_s24, [#allocation4]  }
 0x1b0   :  { %v215_v30 = vpop.f32.mrf.mxu2 }
 0x1b1   :  { %398 = dma.done.wait [#allocation4], 128  }
 0x1b2   :  { %399 = vsyncadd [#allocation4], 4294967168 }
 0x1b3   :  { %234 = vsyncpa [#allocation3], 1 }
 0x1b4   :  { %235 = vsyncpa [#allocation6], 1 }
 0x1b5   :  { %236 = vsyncpa [#allocation4], 1 }

</bundles_post_ra>
